<compile_context>
chip_gen: v5e
topology: v5e:2x2
jax: 0.10.0
libtpu: 0.0.40
codegen_flags: <defaults>
</compile_context>

<pallas_src>
import math

import jax
import jax.numpy as jnp
from jax.experimental import pallas as pl
from jax.experimental.pallas import tpu as pltpu

F32 = jnp.float32
BF16 = jnp.bfloat16

# Small synthetic sizes (real BFM: V=35709, T=70789, img=224/250).
BS = 2          # batch
V = 128         # number of vertices
T = 128         # number of triangles
K_LMK = 68      # number of landmarks
H = W = 16      # image size
LMK_IMG_SIZE = 250.0   # hardcoded in the reference BFMFaceLoss

# Spherical-harmonics constants (match BFMFaceLoss.__init__)
_A0 = math.pi
_A1 = 2.0 * math.pi / math.sqrt(3.0)
_A2 = 2.0 * math.pi / math.sqrt(8.0)
_C0 = 1.0 / math.sqrt(4.0 * math.pi)
_C1 = math.sqrt(3.0) / math.sqrt(4.0 * math.pi)
_C2 = 3.0 * math.sqrt(5.0) / math.sqrt(12.0 * math.pi)


# ----------------------------- Pallas kernels ------------------------------

def _assembly_kernel(coef_ref, basis_t_ref, mean_ref, out_ref):
    # out_tile = mean_tile + coef @ basis^T_tile
    # coef stays VMEM-resident (same block every step); the bf16 basis and the
    # f32 mean stream through in double-buffered 3V tiles.
    acc = jnp.dot(coef_ref[...].astype(jnp.bfloat16), basis_t_ref[...],
                  preferred_element_type=jnp.float32)
    out_ref[...] = mean_ref[...] + acc


def _geometry_kernel(shape_ref, rot_ref, trans_ref, scale_ref,
                     rot_out_ref, fin_out_ref):
    # rot_ref already has the z-flip (columns scaled by [1,1,-1]) baked in, so
    # no in-kernel sublane concat / sign shuffle is needed.
    b = pl.program_id(0)
    r = jnp.dot(rot_ref[0], shape_ref[0],
                preferred_element_type=jnp.float32)          # (3, V)
    rot_out_ref[0] = r
    fin_out_ref[0] = (1.0 + scale_ref[b]) * r + trans_ref[0]  # scale (SMEM) + trans


def _cross_kernel(v1_ref, v2_ref, v3_ref, out_ref):
    e1 = v1_ref[0] - v2_ref[0]                                # (3, T)
    e2 = v2_ref[0] - v3_ref[0]
    # write rows directly instead of a sublane concat
    out_ref[0, 0:1, :] = e1[1:2] * e2[2:3] - e1[2:3] * e2[1:2]
    out_ref[0, 1:2, :] = e1[2:3] * e2[0:1] - e1[0:1] * e2[2:3]
    out_ref[0, 2:3, :] = e1[0:1] * e2[1:2] - e1[1:2] * e2[0:1]


def _lighting_kernel(vnorm_ref, albedo_ref, gamma_ref, out_ref):
    b = pl.program_id(0)
    # vnorm block is (1, 3, 8, V): V lane-dense, 8 on sublanes -> cheap reduce.
    n_sum = jnp.sum(vnorm_ref[0], axis=1)                     # (3, V)
    sumsq = jnp.sum(n_sum * n_sum, axis=0, keepdims=True)     # (1, V)
    # rsqrt on the EUP; clamp sum-of-squares at eps^2 to match F.normalize(eps=1e-12)
    inv_len = jax.lax.rsqrt(jnp.maximum(sumsq, 1e-24))
    n = n_sum * inv_len
    nx, ny, nz = n[0:1, :], n[1:2, :], n[2:3, :]
    ones = jnp.ones_like(nx)
    ys = (
        _A0 * _C0 * ones,
        -_A1 * _C1 * ny,
        _A1 * _C1 * nz,
        -_A1 * _C1 * nx,
        _A2 * _C2 * nx * ny,
        -_A2 * _C2 * ny * nz,
        (_A2 * _C2 * 0.5 / math.sqrt(3.0)) * (3.0 * nz * nz - 1.0),
        -_A2 * _C2 * nx * nz,
        (_A2 * _C2 * 0.5) * (nx * nx - ny * ny),
    )
    # light[c] = sum_i gamma[b, c, i] * Y_i  (27 scalar FMAs, gamma in SMEM);
    # avoids building a (9, V) concat and a padded (3,9)@(9,V) MXU matmul.
    for c in range(3):
        light_c = ys[0] * gamma_ref[b, 9 * c + 0]
        for i in range(1, 9):
            light_c = light_c + ys[i] * gamma_ref[b, 9 * c + i]
        out_ref[0, c:c + 1, :] = light_c * albedo_ref[0, c:c + 1, :]


def _loss_kernel(recon_ref, gt_img_ref, lmk_ref, gt_lmk_ref, out_ref):
    # --- masked image MSE (recon is RGBA flattened to (bs, 4, H*W)) ---
    recon = recon_ref[...]
    mask = (recon[:, 3:4, :] > 0.0).astype(jnp.float32)
    diff = recon[:, 0:3, :] - gt_img_ref[...] * mask
    out_ref[0, 0] = jnp.mean(diff * diff)                     # MSELoss (mean)

    # --- landmark SmoothL1 (beta=1, mean); landmarks laid out (bs, 2, K) ---
    p = (lmk_ref[...] + 1.0) * (LMK_IMG_SIZE / 2.0)
    dx = p[:, 0:1, :] - gt_lmk_ref[:, 0:1, :]
    dy = (LMK_IMG_SIZE - p[:, 1:2, :]) - gt_lmk_ref[:, 1:2, :]   # y-flip
    adx = jnp.abs(dx)
    ady = jnp.abs(dy)
    lx = jnp.where(adx < 1.0, 0.5 * dx * dx, adx - 0.5)
    ly = jnp.where(ady < 1.0, 0.5 * dy * dy, ady - 0.5)
    n_elem = lmk_ref.shape[0] * lmk_ref.shape[1] * lmk_ref.shape[2]
    out_ref[0, 1] = (jnp.sum(lx) + jnp.sum(ly)) / float(n_elem)


# ----------------------------- pallas_call wrappers -------------------------

def _assemble(coef, basis_t, mean_flat, *, tn=None):
    """out = mean + coef @ basis^T, streamed along the 3V axis.

    basis_t: (K, 3V) bf16 in HBM (halves HBM traffic on the dominant kernel);
    the tile axis is 'parallel' so v7x's two TensorCores split the stream.
    Per-tile VMEM (double-buffered) stays well under v7x's 64 MiB budget.
    """
    bs, k = coef.shape
    n = basis_t.shape[1]
    if tn is None:
        if n <= 128:
            tn = n
        elif n <= 8192:
            tn = 128            # small problems: still exercise the streamed path
        else:
            tn = 8192           # real BFM sizes: big tiles amortize grid overhead
    tn = min(tn, n)
    if tn != n:
        tn = max(128, (tn // 128) * 128)   # last-dim block must be a multiple of 128
    return pl.pallas_call(
        _assembly_kernel,
        out_shape=jax.ShapeDtypeStruct((bs, n), F32),
        grid=(pl.cdiv(n, tn),),
        in_specs=[
            pl.BlockSpec((bs, k), lambda j: (0, 0)),   # coef: resident in VMEM
            pl.BlockSpec((k, tn), lambda j: (0, j)),   # basis^T: streamed tiles
            pl.BlockSpec((1, tn), lambda j: (0, j)),   # mean: streamed tiles
        ],
        out_specs=pl.BlockSpec((bs, tn), lambda j: (0, j)),
        compiler_params=pltpu.CompilerParams(
            dimension_semantics=("parallel",)),
    )(coef, basis_t, mean_flat)


def _geometry(shape_cf, rot_t, trans_cf, scale_s):
    bs, _, v = shape_cf.shape
    return pl.pallas_call(
        _geometry_kernel,
        out_shape=(jax.ShapeDtypeStruct((bs, 3, v), F32),
                   jax.ShapeDtypeStruct((bs, 3, v), F32)),
        grid=(bs,),
        in_specs=[pl.BlockSpec((1, 3, v), lambda i: (i, 0, 0)),
                  pl.BlockSpec((1, 3, 3), lambda i: (i, 0, 0)),
                  pl.BlockSpec((1, 3, 1), lambda i: (i, 0, 0)),
                  pl.BlockSpec(memory_space=pltpu.MemorySpace.SMEM)],  # scale scalars
        out_specs=(pl.BlockSpec((1, 3, v), lambda i: (i, 0, 0)),
                   pl.BlockSpec((1, 3, v), lambda i: (i, 0, 0))),
        compiler_params=pltpu.CompilerParams(dimension_semantics=("parallel",)),
    )(shape_cf, rot_t, trans_cf, scale_s)


def _face_cross(v1, v2, v3):
    bs, _, t = v1.shape
    return pl.pallas_call(
        _cross_kernel,
        out_shape=jax.ShapeDtypeStruct((bs, 3, t), F32),
        grid=(bs,),
        in_specs=[pl.BlockSpec((1, 3, t), lambda i: (i, 0, 0))] * 3,
        out_specs=pl.BlockSpec((1, 3, t), lambda i: (i, 0, 0)),
        compiler_params=pltpu.CompilerParams(dimension_semantics=("parallel",)),
    )(v1, v2, v3)


def _lighting(vnorm_g, albedo_cf, gamma_flat):
    bs, _, _, v = vnorm_g.shape
    return pl.pallas_call(
        _lighting_kernel,
        out_shape=jax.ShapeDtypeStruct((bs, 3, v), F32),
        grid=(bs,),
        in_specs=[pl.BlockSpec((1, 3, 8, v), lambda i: (i, 0, 0, 0)),  # lane-dense V
                  pl.BlockSpec((1, 3, v), lambda i: (i, 0, 0)),
                  pl.BlockSpec(memory_space=pltpu.MemorySpace.SMEM)],  # gamma scalars
        out_specs=pl.BlockSpec((1, 3, v), lambda i: (i, 0, 0)),
        compiler_params=pltpu.CompilerParams(dimension_semantics=("parallel",)),
    )(vnorm_g, albedo_cf, gamma_flat)


def _losses(recon_flat, gt_img_flat, lmk_2k, gt_lmk_2k):
    out = pl.pallas_call(
        _loss_kernel,
        out_shape=jax.ShapeDtypeStruct((1, 2), F32),
        in_specs=[pl.BlockSpec(memory_space=pltpu.MemorySpace.VMEM)] * 4,
        out_specs=pl.BlockSpec(memory_space=pltpu.MemorySpace.SMEM),
    )(recon_flat, gt_img_flat, lmk_2k, gt_lmk_2k)
    return out[0, 0], out[0, 1]


# ----------------------------- glue (plain JAX) ------------------------------

def init_bfm_buffers(key):
    """Deterministic synthetic stand-ins for the BFM .mat buffers.
    Bases are stored bf16 in HBM (halves streaming traffic); means stay f32."""
    ks = jax.random.split(key, 8)
    return dict(
        meanshape=jax.random.normal(ks[0], (3 * V,), F32) * 0.5,
        idBase=(jax.random.normal(ks[1], (3 * V, 80), F32) * 0.05).astype(BF16),
        exBase=(jax.random.normal(ks[2], (3 * V, 64), F32) * 0.05).astype(BF16),
        meantex=jax.random.uniform(ks[3], (3 * V,), F32, 0.0, 255.0),
        texBase=(jax.random.normal(ks[4], (3 * V, 80), F32) * 5.0).astype(BF16),
        tri=jax.random.randint(ks[5], (T, 3), 1, V + 1, jnp.int32),        # 1-indexed
        point_buf=jax.random.randint(ks[6], (V, 8), 1, T + 2, jnp.int32),  # 1-indexed (T+1 = zero row)
        keypoints=jax.random.randint(ks[7], (K_LMK,), 0, V, jnp.int32),    # already 0-indexed
    )


def compute_rotation_matrix_t(angles):
    """Returns roll@yaw@pitch, i.e. transpose of torch's rotation_matrix —
    exactly what the channels-first kernel needs (out_cf = M @ shape_cf)."""
    pitch, yaw, roll = angles[:, 0], angles[:, 1], angles[:, 2]
    cp, sp = jnp.cos(pitch), jnp.sin(pitch)
    cy, sy = jnp.cos(yaw), jnp.sin(yaw)
    cr, sr = jnp.cos(roll), jnp.sin(roll)
    z = jnp.zeros_like(cp)
    o = jnp.ones_like(cp)
    pitch_m = jnp.stack([jnp.stack([o, z, z], -1),
                         jnp.stack([z, cp, -sp], -1),
                         jnp.stack([z, sp, cp], -1)], axis=1)
    yaw_m = jnp.stack([jnp.stack([cy, z, sy], -1),
                       jnp.stack([z, o, z], -1),
                       jnp.stack([-sy, z, cy], -1)], axis=1)
    roll_m = jnp.stack([jnp.stack([cr, -sr, z], -1),
                        jnp.stack([sr, cr, z], -1),
                        jnp.stack([z, z, o], -1)], axis=1)
    return jnp.einsum('bij,bjk,bkl->bil', roll_m, yaw_m, pitch_m)


def bfm_face_loss(params, gt_img, gt_lmk, bfm):
    bs = params.shape[0]
    # split(params)
    id_coef = params[:, :80]
    ex_coef = params[:, 80:144]
    tex_coef = params[:, 144:224]
    angles = params[:, 224:227]
    gamma = params[:, 227:254]
    translation = params[:, 254:257]
    scale = params[:, 257:]

    # --- shape / texture assembly (streamed Pallas matmuls, bf16 bases) ---
    shape_basis_t = jnp.concatenate([bfm['idBase'], bfm['exBase']], axis=1).T  # (144, 3V) bf16
    shape_coef = jnp.concatenate([id_coef, ex_coef], axis=1)                   # (bs, 144)
    shape_flat = _assemble(shape_coef, shape_basis_t, bfm['meanshape'][None, :])
    tex_flat = _assemble(tex_coef, bfm['texBase'].T, bfm['meantex'][None, :])

    center = jnp.mean(bfm['meanshape'].reshape(V, 3), axis=0)                  # (3,)
    shape_cf = jnp.transpose(shape_flat.reshape(bs, V, 3) - center, (0, 2, 1)) # (bs, 3, V)
    albedo_cf = jnp.transpose(tex_flat.reshape(bs, V, 3) / 255.0, (0, 2, 1))   # (bs, 3, V)

    # --- rigid transform (Pallas); z-flip baked into the rotation columns ---
    rot_t = compute_rotation_matrix_t(angles) * jnp.asarray([1.0, 1.0, -1.0], F32)
    rotated_cf, final_cf = _geometry(shape_cf, rot_t,
                                     translation.reshape(bs, 3, 1),
                                     scale.reshape(bs).astype(F32))

    # --- vertex normals: gathers in JAX, cross + normalize + lighting in Pallas ---
    face_id = jnp.flip(bfm['tri'].reshape(-1, 3) - 1, axis=1)                  # (T, 3)
    v1 = jnp.take(rotated_cf, face_id[:, 0], axis=2)
    v2 = jnp.take(rotated_cf, face_id[:, 1], axis=2)
    v3 = jnp.take(rotated_cf, face_id[:, 2], axis=2)
    fnorm_cf = _face_cross(v1, v2, v3)                                         # (bs, 3, T)
    fnorm_ext = jnp.concatenate([fnorm_cf, jnp.zeros((bs, 3, 1), F32)], axis=2)
    point_id_t = jnp.transpose(bfm['point_buf'] - 1)                           # (8, V) 0-indexed
    vnorm_g = jnp.take(fnorm_ext, point_id_t, axis=2)                          # (bs, 3, 8, V) lane-dense

    # --- SH lighting (Pallas; per-batch gamma scalars via SMEM) ---
    init_light = jnp.zeros((9,), F32).at[0].set(0.8)
    gamma_flat = (gamma.reshape(bs, 3, 9) + init_light).reshape(bs, 27)
    face_albedo_lit = _lighting(vnorm_g, albedo_cf, gamma_flat)                # (bs, 3, V)
    del face_albedo_lit  # would feed the (untranslatable) soft rasterizer

    # TODO(synk): sr.SoftRenderer rasterization has no clean Pallas equivalent;
    # recon_img is a zero RGBA placeholder (alpha==0 -> mask==0); masked-MSE
    # semantics below are still computed exactly by the fused loss kernel.
    recon_img = jnp.zeros((bs, 4, H, W), F32)

    # --- fused image + landmark losses (single lane-dense Pallas reduction) ---
    lmk_cf = jnp.take(final_cf, bfm['keypoints'], axis=2)                      # (bs, 3, K)
    lmk_xy = lmk_cf[:, :2, :]                                                  # (bs, 2, K)
    gt_lmk_cf = jnp.transpose(gt_lmk.astype(F32), (0, 2, 1))                   # (bs, 2, K)
    img_loss, lmk_loss = _losses(recon_img.reshape(bs, 4, H * W),
                                 gt_img.reshape(bs, 3, H * W),
                                 lmk_xy, gt_lmk_cf)

    # TODO(synk): InceptionResnetV1 ('vggface2') perceptual feature branch is
    # untranslatable here; recog_loss left at 0.
    recog_loss = jnp.float32(0.0)

    all_loss = img_loss + lmk_loss + 10.0 * recog_loss
    return all_loss, img_loss, lmk_loss, recog_loss, recon_img


if __name__ == "__main__":
    key = jax.random.PRNGKey(0)
    k_bfm, k_params, k_img, k_lmk = jax.random.split(key, 4)
    bfm = init_bfm_buffers(k_bfm)
    params = jax.random.normal(k_params, (BS, 258), F32) * 0.1
    gt_img = jax.random.uniform(k_img, (BS, 3, H, W), F32)
    gt_lmk = jax.random.uniform(k_lmk, (BS, K_LMK, 2), F32, 0.0, 250.0)

    out = bfm_face_loss(params, gt_img, gt_lmk, bfm)
    jax.block_until_ready(out)
    print("KERNEL_OK")
</pallas_src>

<mosaic_0001>
module attributes {stable_mosaic.version = 11 : i64} {
  func.func @_assembly_kernel(%arg0: i32, %arg1: memref<2x144xf32, #tpu.memory_space<vmem>>, %arg2: memref<144x128xbf16, #tpu.memory_space<vmem>>, %arg3: memref<1x128xf32, #tpu.memory_space<vmem>>, %arg4: memref<2x128xf32, #tpu.memory_space<vmem>>) attributes {dimension_semantics = [#tpu.dimension_semantics<parallel>], iteration_bounds = array<i64: 3>, scalar_prefetch = 0 : i64, scratch_operands = 0 : i64, tpu.core_type = #tpu.core_type<tc>, window_params = [{pipeline_mode = #tpu.pipeline_mode<synchronous>, transform_indices = @transform_0, window_bounds = array<i64: 2, 144>}, {transform_indices = @transform_1, window_bounds = array<i64: 144, 128>}, {transform_indices = @transform_2, window_bounds = array<i64: 1, 128>}, {transform_indices = @transform_3, window_bounds = array<i64: 2, 128>}]} {
    %c0 = arith.constant 0 : index
    %c0_0 = arith.constant 0 : index
    %0 = vector.load %arg1[%c0, %c0_0] : memref<2x144xf32, #tpu.memory_space<vmem>>, vector<2x144xf32>
    %1 = arith.truncf %0 : vector<2x144xf32> to vector<2x144xbf16>
    %c0_1 = arith.constant 0 : index
    %c0_2 = arith.constant 0 : index
    %2 = vector.load %arg2[%c0_1, %c0_2] : memref<144x128xbf16, #tpu.memory_space<vmem>>, vector<144x128xbf16>
    %cst = arith.constant dense<0.000000e+00> : vector<2x128xf32>
    %3 = tpu.matmul %1, %2, %cst {dimension_numbers = #tpu.dot_dimension_numbers<[1], [0], [0], [1], [0, 0, 1, 1], [], []>} : vector<2x144xbf16>, vector<144x128xbf16>, vector<2x128xf32> -> vector<2x128xf32>
    %c0_3 = arith.constant 0 : index
    %c0_4 = arith.constant 0 : index
    %4 = vector.load %arg3[%c0_3, %c0_4] : memref<1x128xf32, #tpu.memory_space<vmem>>, vector<1x128xf32>
    %5 = vector.broadcast %4 : vector<1x128xf32> to vector<2x128xf32>
    %6 = arith.addf %5, %3 : vector<2x128xf32>
    %c0_5 = arith.constant 0 : index
    %c0_6 = arith.constant 0 : index
    %7 = vector.load %arg4[%c0_5, %c0_6] : memref<2x128xf32, #tpu.memory_space<vmem>>, vector<2x128xf32>
    tpu.vector_store %arg4[%c0_5, %c0_6], %6 {strides = array<i32>} : memref<2x128xf32, #tpu.memory_space<vmem>>, vector<2x128xf32>,
    return
  }
  func.func @transform_0(%arg0: i32) -> (i32, i32) {
    %c0_i32 = arith.constant 0 : i32
    %c0_i32_0 = arith.constant 0 : i32
    %c0_i32_1 = arith.constant 0 : i32
    return %c0_i32, %c0_i32_0 : i32, i32
  }
  func.func @transform_1(%arg0: i32) -> (i32, i32) {
    %c0_i32 = arith.constant 0 : i32
    %c0_i32_0 = arith.constant 0 : i32
    return %c0_i32, %arg0 : i32, i32
  }
  func.func @transform_2(%arg0: i32) -> (i32, i32) {
    %c0_i32 = arith.constant 0 : i32
    %c0_i32_0 = arith.constant 0 : i32
    return %c0_i32, %arg0 : i32, i32
  }
  func.func @transform_3(%arg0: i32) -> (i32, i32) {
    %c0_i32 = arith.constant 0 : i32
    %c0_i32_0 = arith.constant 0 : i32
    return %c0_i32, %arg0 : i32, i32
  }
}

</mosaic_0001>

<bundles_post_ra>
// kernel: tpu_custom_call.1
= control target key start
LH: loop header
LB: loop body
LE: loop exit
PB: predicated region body
PF: predicated region fallthrough
CT: control target
= control target key end

     0   :  { %8 = vsyncpa [#allocation3], 0  ;;  %s950_s0 = inlined_call_operand.hbm [shape: f32[2,144], index: 0, kind: input, shape index: {}]   ;;  %s951_s1 = inlined_call_operand.hbm [shape: bf16[144,384], index: 1, kind: input, shape index: {}]   ;;  %s952_s2 = inlined_call_operand.hbm [shape: f32[1,384], index: 2, kind: input, shape index: {}]   ;;  %s953_s3 = inlined_call_operand.hbm [shape: f32[2,384], index: 3, kind: output, shape index: {}]  }
   0x1   :  { %9 = vsyncpa [#allocation6], 0 }
   0x2   :  { %11 = vsyncpa [#allocation6 + $0x1], 0 }
   0x3   :  { %12 = vsyncpa [#allocation4], 0 }
   0x4   :  { %14 = vsyncpa [#allocation4 + $0x1], 0  ;;  %s781_s12 = smov 0   ;;  %s783_s13 = smov 0  }
   0x5   :  { %s785_s14 = smov 0   ;;  %s787_s15 = smov 0  }
   0x6 LB: > { %s802_s16 = sadd.s32 1, %s755_s15   ;;  %s48_s17 = sadd.s32 1, %s751_s14  ;;  %s755_s15 = sphi %s787_s15, %s965_s15   ;;  %s751_s14 = sphi %s785_s14, %s964_s14   ;;  %s747_s13 = sphi %s783_s13, %s963_s13   ;;  %s743_s12 = sphi %s781_s12, %s962_s12  }
   0x7   : > { %s45_s18 = ssub.s32 %s755_s15, %s802_s16  ;;  %p55_p0 = scmp.ne.s32.totalorder %s751_s14, %s747_s13 }
   0x8   : > { %p46_p1 = scmp.eq.s32.totalorder %s45_s18, 0  ;;  %p56_p2 = scmp.eq.s32.totalorder %s755_s15, 0 }
   0x9   : > { %p555_p3 = scmp.lt.s32.totalorder %s755_s15, 3  ;;  %s149_s20 = sand.u32 1, %s755_s15  }
   0xa   : > { %s812_s19 = scalar_select %p46_p1, %s751_s14, %s48_s17  }
   0xb   : > { %p57_p4 = por %p56_p2, %p55_p0  ;;  %s151_s21 = sand.u32 1, %s751_s14  }
   0xc   : > { %s527_s22 = smul.u32 72, %s151_s21  ;;  %s473_s23 = sshll.u32 %s755_s15, 2 }
   0xd   : > { %s157_s26 = scalar_lea.hbm %s951_s1, %s473_s23  ;;  %p825_p5 = pnand %p555_p3, %p57_p4 }
   0xe   : > { %s158_s28 = sshll.u32 %s157_s26, 4  ;;  %s153_s29 = scalar_lea.vmem [#allocation5], %s527_s22  ;;  %s159_s28 = int_to_ptr.hbm [resolvable:$true] %s158_s28 }
   0xf   : > { %s160_s30 = sshll.u32 %s153_s29, 4  ;;  %s829_s4 = scalar_lea.sflag [#allocation6], %s149_s20  ;;  %s161_s30 = int_to_ptr.vmem [resolvable:$true] %s160_s30 }
  0x10   : > { %s595_s5 = sshra.s32 %s159_s28, 4  ;;  %p599_p7 = pneg %p825_p5  ;;  %s596_s5 = int_to_ptr.hbm [resolvable:$true] %s595_s5 }
  0x11   : > { %s597_s6 = scalar_lea.hbm %s596_s5, 72  ;;  %s602_s9 = scalar_lea.hbm %s951_s1, 216 }
  0x12   : > { %p598_p6 = scmp.ne.s32.totalorder %s596_s5, %s597_s6  ;;  %p603_p10 = scmp.lt.s32.totalorder %s596_s5, %s951_s1 }
  0x13   : > { %p604_p11 = scmp.lt.s32.totalorder %s602_s9, %s597_s6 }
  0x14   : > { %p600_p8 = pnand %p599_p7, %p598_p6 }
  0x15   : > { %p605_p12 = por %p604_p11, %p603_p10 }
  0x16   : > { %p601_p9 = pneg %p600_p8 }
  0x18   : > { %p606_p13 = pnand %p605_p12, %p601_p9 }
  0x1a   : > { %609 = shalt.err (!%p606_p13)
}
  0x1b   : > { %s757_s17 = smov 192   ;;  %s758_s18 = smov 64  }
  0x1c   : > { %s759_s20 = smov 4   ;;  %s846_s22 = sadd.s32 4294967295, %s755_s15  }
  0x1d   : > { %546 = dma.hbm_to_vmem [thread:$0]  (!%p825_p5), %s159_s28, 1152, %s161_s30, %s829_s4, %s757_s17, %s758_s18, %s759_s20  }
  0x1e   : > { %s469_s23 = sadd.s32 4294967294, %s755_s15   ;;  %p61_p1 = scmp.ne.s32.totalorder %s747_s13, %s743_s12 }
  0x1f   : > { %p954_p2 = scmp.eq.s32.totalorder %s846_s22, 0  ;;  %p111_p3 = scmp.eq.s32.totalorder %s846_s22, 2 }
  0x20   : > { %p117_p4 = scmp.eq.s32.totalorder %s469_s23, 2  ;;  %p470_p6 = scmp.ge.s32.totalorder %s755_s15, 1 }
  0x21   : > { %p856_p8 = por %p954_p2, %p61_p1  ;;  %p863_p9 = por %p111_p3, %p55_p0 }
  0x22   : > { %p867_p10 = por %p117_p4, %p61_p1  ;;  %p124_p11 = scmp.lt.s32.totalorder %s755_s15, 4 }
  0x23   : > { %s136_s30 = sshll.u32 %s950_s0, 4  ;;  %s760_s6 = smov [#allocation2]   ;;  %s137_s30 = int_to_ptr.hbm [resolvable:$true] %s136_s30 }
  0x24   : > { %p875_p12 = pnand %p470_p6, %p124_p11  ;;  %s138_s7 = sshll.u32 %s760_s6, 4  ;;  %s139_s7 = int_to_ptr.vmem [resolvable:$true] %s138_s7 }
  0x25   : > { %s176_s10 = scalar_lea.hbm %s952_s2, %s755_s15  ;;  %s173_s17 = scalar_lea.vmem [#allocation7], %s151_s21 }
  0x26   : > { %p539_p0 = pneg %p875_p12  ;;  %s178_s11 = sshll.u32 %s176_s10, 4  ;;  %s179_s11 = int_to_ptr.hbm [resolvable:$true] %s178_s11 }
  0x27   : > { %s180_s18 = sshll.u32 %s173_s17, 4  ;;  %s655_s20 = sshra.s32 %s179_s11, 4  ;;  %s181_s18 = int_to_ptr.vmem [resolvable:$true] %s180_s18  ;;  %s656_s20 = int_to_ptr.hbm [resolvable:$true] %s655_s20 }
  0x28   : > { %p540_p13 = pnand %p539_p0, %p954_p2  ;;  %s657_s23 = scalar_lea.hbm %s656_s20, 1 }
  0x29   : > { %p658_p1 = scmp.ne.s32.totalorder %s656_s20, %s657_s23  ;;  %s662_s6 = scalar_lea.hbm %s952_s2, 3 }
  0x2a   : > { %542 = dma.hbm_to_vmem [thread:$0]  (!%p540_p13), %s137_s30, 64, %s139_s7, [#allocation3]  }
  0x2b   : > { %p660_p3 = pnand %p658_p1, %p599_p7  ;;  %p663_p6 = scmp.lt.s32.totalorder %s656_s20, %s952_s2 }
  0x2c   : > { %p664_p11 = scmp.lt.s32.totalorder %s662_s6, %s657_s23 }
  0x2d   : > { %p661_p4 = pneg %p660_p3 }
  0x2e   : > { %p665_p0 = por %p664_p11, %p663_p6 }
  0x30   : > { %p666_p2 = pnand %p665_p0, %p661_p4 }
  0x32   : > { %669 = shalt.err (!%p666_p2)
}
  0x33   : > { %549 = dma.hbm_to_vmem [thread:$0]  (!%p825_p5), %s179_s11, 16, %s181_s18, %s829_s4  }
  0x34   : > { %189 = sbr.rel (%p875_p12) target bundleno = 229 (0xe5), region = 32  ;;  %p960_p7 = scmp.eq.s32.totalorder (!%p875_p12), %s846_s22, 0 }
  0x39   : > { %730 = dma.done.wait (%p960_p7), [#allocation3], 64   ;;  %p961_p13 = pmov %p960_p7 }
  0x3a   : > { %s196_s21 = sand.u32 1, %s846_s22   ;;  %s909_s30 = sand.u32 1, %s747_s13  }
  0x3b   : > { %732 = vsyncadd (%p961_p13), [#allocation3], 4294967232  ;;  %s528_s7 = smul.u32 72, %s909_s30  ;;  %s197_s27 = scalar_lea.sflag [#allocation6], %s196_s21 }
  0x3d   : > { %s200_s10 = scalar_lea.vmem [#allocation5], %s528_s7 }
  0x3e   : > { %734 = dma.done.wait (%p856_p8), %s197_s27, 1168  }
  0x3f   : > { %736 = vsyncadd (%p856_p8), %s197_s27, 4294966128  ;;  %v525_v0 = vld [vmem:[%s200_s10 + $0x38] sm:$0xff]  ;;  %v524_v1 = vld [vmem:[%s200_s10 + $0x30] sm:$0xff]  ;;  %vm319_vm0 = vcmask 130048   ;;  %s209_s4 = scalar_lea.vmem [#allocation7], %s909_s30  ;;  %s476_s24 = sshll.u32 %s909_s30, 1 }
  0x40   : > { %323 = vmatpush.bf16.msra.mxu0 %v525_v0  ;;  %v526_v2 = vld [vmem:[%s200_s10 + $0x40] sm:$0xff]  ;;  %v238_v3 = vld [vmem:[#allocation2] sm:$0xf]  ;;  %v523_v4 = vld [vmem:[%s200_s10 + $0x28] sm:$0xff]  ;;  %s515_s5 = sshll.u32 %s846_s22, 1  ;;  %s236_s20 = scalar_lea.vmem [#allocation8], %s476_s24 }
  0x41   : > { %240 = vst [vmem:[#allocation1] ss:$4 sm:$0xff] %v238_v3  ;;  %343 = vmatpush.bf16.msra.mxu1 %v526_v2  ;;  %v522_v5 = vld [vmem:[%s200_s10 + $0x20] sm:$0xff]  ;;  %v521_v8 = vld [vmem:[%s200_s10 + $0x18] sm:$0xff]  ;;  %v520_v9 = vld [vmem:[%s200_s10 + $0x10] sm:$0xff]  ;;  %s366_s18 = scalar_lea.hbm %s953_s3, %s515_s5  ;;  %s368_s23 = sshll.u32 %s236_s20, 4  ;;  %s369_s23 = int_to_ptr.vmem [resolvable:$true] %s368_s23 }
  0x42   : > { %v519_v10 = vld [vmem:[%s200_s10 + $0x8] sm:$0xff]  ;;  %v518_v11 = vld [vmem:[%s200_s10] sm:$0xff]  ;;  %s370_s28 = sshll.u32 %s366_s18, 4  ;;  %s356_s29 = scalar_lea.sflag [#allocation4], %s909_s30  ;;  %s371_s28 = int_to_ptr.hbm [resolvable:$true] %s370_s28 }
  0x43   : > { %v594_v16 = vld [vmem:[%s209_s4] ss:$0 sm:$0xff]  ;;  %s699_s6 = sshra.s32 %s371_s28, 4  ;;  %s705_s21 = scalar_lea.hbm %s953_s3, 6  ;;  %s700_s6 = int_to_ptr.hbm [resolvable:$true] %s699_s6 }
  0x44   : > { %324 = vmatpush.bf16.msra.mxu0 %v524_v1  ;;  %s701_s8 = scalar_lea.hbm %s700_s6, 2  ;;  %p706_p12 = scmp.lt.s32.totalorder %s700_s6, %s953_s3 }
  0x45   : > { %p702_p5 = scmp.ne.s32.totalorder %s700_s6, %s701_s8  ;;  %p707_p1 = scmp.lt.s32.totalorder %s705_s21, %s701_s8 }
  0x47   : > { %p703_p2 = pnand %p702_p5, %p863_p9  ;;  %p708_p3 = por %p707_p1, %p706_p12 }
  0x48   : > { %325 = vmatpush.bf16.msra.mxu0 %v523_v4  ;;  %v242_v6 = vld.sshfl [vmem:[#allocation1 + $0x8] sm:$0xff pattern:$0x73625140]  ;;  %v241_v12 = vld.sshfl [vmem:[#allocation1] sm:$0xff pattern:$0x73625140] }
  0x49   : > { %v246_v7 = vpack.c.bf16 %v242_v6, %v242_v6  ;;  %v245_v13 = vpack.c.bf16 %v241_v12, %v241_v12  ;;  %p704_p8 = pneg %p703_p2 }
  0x4b   : > { %513 = vmatmul.msk.bf16.vlgmr.msra.gmra.mxu1 %vm319_vm0, %v246_v7  ;;  %p709_p4 = pnand %p708_p3, %p704_p8 }
  0x4c   : > { %326 = vmatpush.bf16.msra.mxu0 %v522_v5 }
  0x50   : > { %327 = vmatpush.bf16.msra.mxu0 %v521_v8 }
  0x54   : > { %328 = vmatpush.bf16.msra.mxu0 %v520_v9 }
  0x58   : > { %329 = vmatpush.bf16.msra.mxu0 %v519_v10 }
  0x5c   : > { %330 = vmatpush.bf16.msra.mxu0 %v518_v11 }
  0x5f   : > { %331 = vmatmul.bf16.vlgmr.msra.gmra.mxu0 %v245_v13 }
  0xc8   : > { %v345_v14 = vpop.f32.mrf.mxu1 }
  0xd0   : > { %v347_v15 = vpop.f32.mrf.mxu1 }
  0xdc   : > { %v332_v17 = vpop.f32.mrf.mxu0 }
  0xdd   : > { %v346_v18 = vadd.f32 %v345_v14, %v332_v17 }
  0xdf   : > { %v353_v19 = vadd.f32 %v594_v16, %v346_v18 }
  0xe1   : > { %354 = vst [vmem:[%s236_s20] sm:$0x3] %v353_v19 }
  0xe2   : > { %712 = shalt.err (!%p709_p4)
}
  0xe3   : > { %537 = dma.vmem_to_hbm [thread:$0]  (%p863_p9), %s369_s23, 32, %s371_s28, %s356_s29  }
  0xe4   : > { %v334_v20 = vpop.f32.mrf.mxu0 }
  0xe5 PF: > { %p557_p6 = scmp.ge.s32.totalorder %s755_s15, 2  ;;  %s382_s30 = sand.u32 1, %s743_s12  }
  0xe6   : > { %s383_s10 = scalar_lea.sflag [#allocation4], %s382_s30 }
  0xe7   : > { %p551_p11 = pnand %p557_p6, %p867_p10 }
  0xe9   : > { %p552_p0 = pneg %p551_p11 }
  0xeb   : > { %738 = dma.done.wait (%p552_p0), %s383_s10, 32  }
  0xec   : > { %740 = vsyncadd (%p552_p0), %s383_s10, 4294967264  ;;  %p17_p7 = scmp.ge.s32.totalorder %s802_s16, 5   ;;  %s962_s12 = smov %s747_s13 }
  0xed   : > { %s963_s13 = smov %s751_s14  ;;  %s964_s14 = smov %s812_s19 }
  0xee   : > { %s965_s15 = smov %s802_s16  ;;  %19 = sbr.rel (!%p17_p7) target bundleno = 6 (0x6), region = 93 }
  0xf3   :  { %389 = vsyncpa [#allocation3], 1 }
  0xf4   :  { %391 = vsyncpa [#allocation3 + $0x1], 1 }
  0xf5   :  { %392 = vsyncpa [#allocation6], 1 }
  0xf6   :  { %394 = vsyncpa [#allocation6 + $0x1], 1 }
  0xf7   :  { %395 = vsyncpa [#allocation4], 1 }
  0xf8   :  { %397 = vsyncpa [#allocation4 + $0x1], 1 }

</bundles_post_ra>
